<compile_context>
chip_gen: v7x
topology: tpu7x:2x2x1
jax: 0.10.0
libtpu: 0.0.40
codegen_flags: <defaults>
</compile_context>

<pallas_src>
import functools

import numpy as np
import jax
import jax.numpy as jnp
from jax.experimental import pallas as pl
from jax.experimental.pallas import tpu as pltpu


_LANE = 128
_SUBLANE = 8
_TILE_BUDGET_BYTES = 2 << 20      # padded-VMEM budget per (double-buffered) tile
_VMEM_LIMIT_BYTES = 32 << 20      # safe on v5e/v6e (128 MiB phys) and v7x (64 MiB)


def _round_up(x, m):
    return ((x + m - 1) // m) * m


def _pick_tile(extent, unit_bytes, align, min_blocks):
    """Largest tile (multiple of `align`, or the full extent) whose padded
    VMEM footprint stays within the per-buffer budget, while keeping at least
    `min_blocks` grid steps when the extent allows it (pipelining + megacore
    sharding of the 'parallel' axis)."""
    t = max(align, (_TILE_BUDGET_BYTES // max(unit_bytes, 1)) // align * align)
    if min_blocks > 1 and extent > align * min_blocks:
        t = min(t, _round_up(pl.cdiv(extent, min_blocks), align))
    if t >= extent:
        return extent
    return t


# ---------------------------------------------------------------------------
# Kernels
# ---------------------------------------------------------------------------

def _ln_rows_kernel(x_ref, w_ref, b_ref, o_ref, *, eps):
    # x_ref: (tm, C) tile, channel on the lane axis.  w/b: (1, C) float32.
    x = x_ref[...].astype(jnp.float32)
    mean = jnp.mean(x, axis=-1, keepdims=True)
    xc = x - mean
    var = jnp.mean(xc * xc, axis=-1, keepdims=True)   # biased var (F.layer_norm)
    inv = jax.lax.rsqrt(var + eps)
    o_ref[...] = (xc * inv * w_ref[...] + b_ref[...]).astype(o_ref.dtype)


def _ln_channels_kernel(x_ref, w_ref, b_ref, o_ref, *, eps):
    # x_ref: (C, ts) tile in the native NC... layout — channel on the sublane
    # axis (reduced via XLU), spatial on the lane axis (lane-dense for tiny C).
    # w/b: (C, 1) float32, broadcast over the spatial lanes.
    x = x_ref[...].astype(jnp.float32)
    mean = jnp.mean(x, axis=0, keepdims=True)
    xc = x - mean
    var = jnp.mean(xc * xc, axis=0, keepdims=True)
    inv = jax.lax.rsqrt(var + eps)
    o_ref[...] = (xc * inv * w_ref[...] + b_ref[...]).astype(o_ref.dtype)


# ---------------------------------------------------------------------------
# Wrappers
# ---------------------------------------------------------------------------

def _layernorm_channels_last(x2, weight, bias, eps):
    """x2: (M, C); normalize each row over C (lane axis)."""
    M, C = x2.shape
    unit = _round_up(C, _LANE) * 4                    # padded f32 bytes per row
    tm = _pick_tile(M, unit, _SUBLANE, min_blocks=4)
    grid = (pl.cdiv(M, tm),)
    w2 = weight.reshape(1, C).astype(jnp.float32)
    b2 = bias.reshape(1, C).astype(jnp.float32)
    nbytes = x2.dtype.itemsize
    cost = pl.CostEstimate(flops=8 * M * C, transcendentals=M,
                           bytes_accessed=2 * M * C * nbytes + 8 * C)
    # TODO(synk): for very small C (<128) the lane axis is under-filled here;
    # a row-packing (block-diagonal matmul) variant would be fully lane-dense.
    return pl.pallas_call(
        functools.partial(_ln_rows_kernel, eps=eps),
        out_shape=jax.ShapeDtypeStruct((M, C), x2.dtype),
        grid_spec=pltpu.PrefetchScalarGridSpec(
            num_scalar_prefetch=0,
            grid=grid,
            in_specs=[
                pl.BlockSpec((tm, C), lambda i: (i, 0)),
                pl.BlockSpec((1, C), lambda i: (0, 0)),
                pl.BlockSpec((1, C), lambda i: (0, 0)),
            ],
            out_specs=pl.BlockSpec((tm, C), lambda i: (i, 0)),
        ),
        compiler_params=pltpu.CompilerParams(
            dimension_semantics=("parallel",),
            vmem_limit_bytes=_VMEM_LIMIT_BYTES),
        cost_estimate=cost,
    )(x2, w2, b2)


def _layernorm_channels_first(x3, weight, bias, eps):
    """x3: (B, C, S); normalize over the channel axis, native layout."""
    B, C, S = x3.shape
    unit = _round_up(C, _SUBLANE) * 4                 # padded f32 bytes per lane
    ts = _pick_tile(S, unit, _LANE, min_blocks=max(1, pl.cdiv(8, B)))
    grid = (B, pl.cdiv(S, ts))
    wc = weight.reshape(C, 1).astype(jnp.float32)
    bc = bias.reshape(C, 1).astype(jnp.float32)
    nbytes = x3.dtype.itemsize
    cost = pl.CostEstimate(flops=8 * B * C * S, transcendentals=B * S,
                           bytes_accessed=2 * B * C * S * nbytes + 8 * C)
    return pl.pallas_call(
        functools.partial(_ln_channels_kernel, eps=eps),
        out_shape=jax.ShapeDtypeStruct((B, C, S), x3.dtype),
        grid_spec=pltpu.PrefetchScalarGridSpec(
            num_scalar_prefetch=0,
            grid=grid,
            in_specs=[
                pl.BlockSpec((None, C, ts), lambda b, s: (b, 0, s)),
                pl.BlockSpec((C, 1), lambda b, s: (0, 0)),
                pl.BlockSpec((C, 1), lambda b, s: (0, 0)),
            ],
            out_specs=pl.BlockSpec((None, C, ts), lambda b, s: (b, 0, s)),
        ),
        compiler_params=pltpu.CompilerParams(
            dimension_semantics=("parallel", "parallel"),
            vmem_limit_bytes=_VMEM_LIMIT_BYTES),
        cost_estimate=cost,
    )(x3, wc, bc)


class LayerNormPallas:
    """JAX/Pallas equivalent of the PyTorch LayerNorm module."""

    def __init__(self, normalized_shape, eps=1e-6, data_format="channels_last",
                 weight=None, bias=None):
        if data_format not in ["channels_last", "channels_first"]:
            raise NotImplementedError
        self.eps = float(eps)
        self.data_format = data_format
        self.normalized_shape = (int(normalized_shape),)
        c = self.normalized_shape[0]
        self.weight = (jnp.ones((c,), jnp.float32) if weight is None
                       else jnp.asarray(weight, jnp.float32))
        self.bias = (jnp.zeros((c,), jnp.float32) if bias is None
                     else jnp.asarray(bias, jnp.float32))

    def __call__(self, x):
        c = self.normalized_shape[0]
        if self.data_format == "channels_last":
            # (..., C): collapsing leading dims is a free (contiguous) reshape.
            assert x.shape[-1] == c
            lead = x.shape[:-1]
            m = int(np.prod(lead)) if lead else 1
            y = _layernorm_channels_last(x.reshape(m, c), self.weight,
                                         self.bias, self.eps)
            return y.reshape(x.shape)
        else:
            # channels_first: (B, C, *spatial) — keep native layout, collapse
            # the spatial dims (free reshape); no transpose round-trips.
            assert x.shape[1] == c
            b = x.shape[0]
            s = int(np.prod(x.shape[2:])) if x.ndim > 2 else 1
            y = _layernorm_channels_first(x.reshape(b, c, s), self.weight,
                                          self.bias, self.eps)
            return y.reshape(x.shape)


# ---------------------------------------------------------------------------
# Pure-JAX references
# ---------------------------------------------------------------------------

def _ref_channels_first(x, w, b, eps):
    u = x.mean(1, keepdims=True)
    s = ((x - u) ** 2).mean(1, keepdims=True)
    xn = (x - u) / jnp.sqrt(s + eps)
    bc = (slice(None),) + (None,) * (x.ndim - 2)
    return w[bc] * xn + b[bc]


def _ref_channels_last(x, w, b, eps):
    u = x.mean(-1, keepdims=True)
    s = ((x - u) ** 2).mean(-1, keepdims=True)
    return (x - u) / jnp.sqrt(s + eps) * w + b


if __name__ == "__main__":
    key = jax.random.PRNGKey(0)
    k1, k2, k3, k4, k5 = jax.random.split(key, 5)

    # ---- channels_first case: x is NCHW, normalized_shape = C = 4 ----
    C1 = 4
    x_cf = jax.random.normal(k1, (2, C1, 16, 16), jnp.float32)
    w1 = jax.random.normal(k2, (C1,), jnp.float32) * 0.1 + 1.0
    b1 = jax.random.normal(k3, (C1,), jnp.float32) * 0.1
    ln_cf = LayerNormPallas(C1, eps=1e-6, data_format="channels_first",
                            weight=w1, bias=b1)
    y_cf = jax.block_until_ready(ln_cf(x_cf))
    ref_cf = _ref_channels_first(x_cf, w1, b1, 1e-6)
    np.testing.assert_allclose(np.asarray(y_cf), np.asarray(ref_cf),
                               rtol=1e-5, atol=1e-5)

    # ---- channels_last case: x is (B, N, C), normalized_shape = C = 32 ----
    C2 = 32
    x_cl = jax.random.normal(k4, (2, 8, C2), jnp.float32)
    w2 = jax.random.normal(k5, (C2,), jnp.float32) * 0.1 + 1.0
    b2 = jnp.zeros((C2,), jnp.float32)
    ln_cl = LayerNormPallas(C2, eps=1e-6, data_format="channels_last",
                            weight=w2, bias=b2)
    y_cl = jax.block_until_ready(ln_cl(x_cl))
    ref_cl = _ref_channels_last(x_cl, w2, b2, 1e-6)
    np.testing.assert_allclose(np.asarray(y_cl), np.asarray(ref_cl),
                               rtol=1e-5, atol=1e-5)

    print("KERNEL_OK")
</pallas_src>

<mosaic_0001>
module attributes {stable_mosaic.version = 11 : i64} {
  func.func @_ln_channels_kernel(%arg0: i32, %arg1: i32, %arg2: memref<1x4x256xf32, #tpu.memory_space<vmem>>, %arg3: memref<4x1xf32, #tpu.memory_space<vmem>>, %arg4: memref<4x1xf32, #tpu.memory_space<vmem>>, %arg5: memref<1x4x256xf32, #tpu.memory_space<vmem>>) attributes {dimension_semantics = [#tpu.dimension_semantics<parallel>, #tpu.dimension_semantics<parallel>], iteration_bounds = array<i64: 2, 1>, scalar_prefetch = 0 : i64, scratch_operands = 0 : i64, tpu.core_type = #tpu.core_type<tc>, window_params = [{transform_indices = @transform_0, window_bounds = array<i64: 1, 4, 256>}, {pipeline_mode = #tpu.pipeline_mode<synchronous>, transform_indices = @transform_1, window_bounds = array<i64: 4, 1>}, {pipeline_mode = #tpu.pipeline_mode<synchronous>, transform_indices = @transform_2, window_bounds = array<i64: 4, 1>}, {transform_indices = @transform_3, window_bounds = array<i64: 1, 4, 256>}]} {
    %c0 = arith.constant 0 : index
    %c0_0 = arith.constant 0 : index
    %c0_1 = arith.constant 0 : index
    %0 = vector.load %arg2[%c0, %c0_0, %c0_1] : memref<1x4x256xf32, #tpu.memory_space<vmem>>, vector<1x4x256xf32>
    %1 = vector.shape_cast %0 : vector<1x4x256xf32> to vector<4x256xf32>
    %cst = arith.constant dense<0.000000e+00> : vector<256xf32>
    %2 = vector.multi_reduction <add>, %1, %cst [0] : vector<4x256xf32> to vector<256xf32>
    %3 = vector.shape_cast %2 : vector<256xf32> to vector<1x256xf32>
    %cst_2 = arith.constant 4.000000e+00 : f32
    %4 = vector.broadcast %cst_2 : f32 to vector<1x256xf32>
    %5 = arith.divf %3, %4 : vector<1x256xf32>
    %6 = vector.broadcast %5 : vector<1x256xf32> to vector<4x256xf32>
    %7 = arith.subf %1, %6 : vector<4x256xf32>
    %8 = arith.mulf %7, %7 : vector<4x256xf32>
    %cst_3 = arith.constant dense<0.000000e+00> : vector<256xf32>
    %9 = vector.multi_reduction <add>, %8, %cst_3 [0] : vector<4x256xf32> to vector<256xf32>
    %10 = vector.shape_cast %9 : vector<256xf32> to vector<1x256xf32>
    %cst_4 = arith.constant 4.000000e+00 : f32
    %11 = vector.broadcast %cst_4 : f32 to vector<1x256xf32>
    %12 = arith.divf %10, %11 : vector<1x256xf32>
    %cst_5 = arith.constant 9.99999997E-7 : f32
    %13 = vector.broadcast %cst_5 : f32 to vector<1x256xf32>
    %14 = arith.addf %12, %13 : vector<1x256xf32>
    %15 = math.rsqrt %14 : vector<1x256xf32>
    %16 = vector.broadcast %15 : vector<1x256xf32> to vector<4x256xf32>
    %17 = arith.mulf %7, %16 : vector<4x256xf32>
    %c0_6 = arith.constant 0 : index
    %c0_7 = arith.constant 0 : index
    %18 = vector.load %arg3[%c0_6, %c0_7] : memref<4x1xf32, #tpu.memory_space<vmem>>, vector<4x1xf32>
    %19 = vector.broadcast %18 : vector<4x1xf32> to vector<4x256xf32>
    %20 = arith.mulf %17, %19 : vector<4x256xf32>
    %c0_8 = arith.constant 0 : index
    %c0_9 = arith.constant 0 : index
    %21 = vector.load %arg4[%c0_8, %c0_9] : memref<4x1xf32, #tpu.memory_space<vmem>>, vector<4x1xf32>
    %22 = vector.broadcast %21 : vector<4x1xf32> to vector<4x256xf32>
    %23 = arith.addf %20, %22 : vector<4x256xf32>
    %c0_10 = arith.constant 0 : index
    %c0_11 = arith.constant 0 : index
    %c0_12 = arith.constant 0 : index
    %24 = vector.load %arg5[%c0_10, %c0_11, %c0_12] : memref<1x4x256xf32, #tpu.memory_space<vmem>>, vector<1x4x256xf32>
    %25 = vector.shape_cast %24 : vector<1x4x256xf32> to vector<4x256xf32>
    %26 = vector.shape_cast %23 : vector<4x256xf32> to vector<1x4x256xf32>
    tpu.vector_store %arg5[%c0_10, %c0_11, %c0_12], %26 {strides = array<i32>} : memref<1x4x256xf32, #tpu.memory_space<vmem>>, vector<1x4x256xf32>,
    return
  }
  func.func @transform_0(%arg0: i32, %arg1: i32) -> (i32, i32, i32) {
    %c0_i32 = arith.constant 0 : i32
    %c0_i32_0 = arith.constant 0 : i32
    return %arg0, %c0_i32, %arg1 : i32, i32, i32
  }
  func.func @transform_1(%arg0: i32, %arg1: i32) -> (i32, i32) {
    %c0_i32 = arith.constant 0 : i32
    %c0_i32_0 = arith.constant 0 : i32
    %c0_i32_1 = arith.constant 0 : i32
    return %c0_i32, %c0_i32_0 : i32, i32
  }
  func.func @transform_2(%arg0: i32, %arg1: i32) -> (i32, i32) {
    %c0_i32 = arith.constant 0 : i32
    %c0_i32_0 = arith.constant 0 : i32
    %c0_i32_1 = arith.constant 0 : i32
    return %c0_i32, %c0_i32_0 : i32, i32
  }
  func.func @transform_3(%arg0: i32, %arg1: i32) -> (i32, i32, i32) {
    %c0_i32 = arith.constant 0 : i32
    %c0_i32_0 = arith.constant 0 : i32
    return %arg0, %c0_i32, %arg1 : i32, i32, i32
  }
}

</mosaic_0001>

<bundles_post_ra>
// kernel: tpu_custom_call.1
= control target key start
LH: loop header
LB: loop body
LE: loop exit
PB: predicated region body
PF: predicated region fallthrough
CT: control target
= control target key end

     0   :  { %8 = vsyncpa [#allocation3], 0  ;;  %s804_s0 = inlined_call_operand.hbm [shape: f32[2,4,256], index: 0, kind: input, shape index: {}]   ;;  %s805_s1 = inlined_call_operand.vmem [shape: f32[4,1], index: 1, kind: input, shape index: {}]   ;;  %s806_s2 = inlined_call_operand.vmem [shape: f32[4,1], index: 2, kind: input, shape index: {}]   ;;  %s807_s3 = inlined_call_operand.hbm [shape: f32[2,4,256], index: 3, kind: output, shape index: {}]  }
   0x1   :  { %10 = vsyncpa [#allocation3 + $0x1], 0 }
   0x2   :  { %11 = vsyncpa [#allocation4], 0 }
   0x3   :  { %13 = vsyncpa [#allocation4 + $0x1], 0  ;;  %s618_s12 = smov 0   ;;  %s620_s13 = smov 0  }
   0x4   :  { %s622_s14 = smov 0   ;;  %s624_s15 = smov 0  }
   0x5   :  { %s626_s16 = smov 0   ;;  %s628_s17 = smov 0  }
   0x6 LB: > { %s393_s18 = sadd.s32 4294967295, %s592_s17   ;;  %s394_s19 = sadd.s32 4294967294, %s592_s17   ;;  %s592_s17 = sphi %s628_s17, %s19_s17   ;;  %s588_s16 = sphi %s626_s16, %s823_s16   ;;  %s584_s15 = sphi %s624_s15, %s822_s15   ;;  %s580_s14 = sphi %s622_s14, %s821_s14   ;;  %s576_s13 = sphi %s620_s13, %s820_s13   ;;  %s572_s12 = sphi %s618_s12, %s819_s12  }
   0x7   : > { %s31_s20 = sadd.s32 1, %s588_s16  ;;  %s40_s21 = sadd.s32 1, %s580_s14 }
   0x8   : > { %p33_p0 = scmp.ge.s32.totalorder %s31_s20, 2  ;;  %p47_p1 = scmp.ne.s32.totalorder %s580_s14, %s576_s13 }
   0x9   : > { %p48_p2 = scmp.eq.s32.totalorder %s592_s17, 0  ;;  %p53_p3 = scmp.ne.s32.totalorder %s576_s13, %s572_s12 }
   0xa   : > { %s825_s20 = smov (%p33_p0, %s31_s20), 0  ;;  %p54_p5 = scmp.eq.s32.totalorder %s393_s18, 0 }
   0xb   : > { %p659_p4 = por %p48_p2, %p47_p1  ;;  %s35_s23 = ssub.s32 %s588_s16, %s825_s20 }
   0xc   : > { %p121_p6 = scmp.eq.s32.totalorder %s393_s18, 1  ;;  %p38_p7 = scmp.eq.s32.totalorder %s35_s23, 0 }
   0xd   : > { %p665_p8 = por %p54_p5, %p53_p3  ;;  %p127_p10 = scmp.eq.s32.totalorder %s394_s19, 1 }
   0xe   : > { %p669_p9 = por %p121_p6, %p47_p1  ;;  %p422_p13 = scmp.lt.s32.totalorder %s592_s17, 2 }
   0xf   : > { %s674_s26 = scalar_select %p38_p7, %s580_s14, %s40_s21  }
  0x10   : > { %s811_s25 = scalar_select %p669_p9, 1, 0 }
  0x11   : > { %p676_p11 = por %p127_p10, %p53_p3  ;;  %s153_s28 = sand.u32 1, %s580_s14  }
  0x12   : > { %s397_s29 = sshll.u32 %s153_s28, 3  ;;  %s408_s30 = sshll.u32 %s588_s16, 7 }
  0x13   : > { %s812_s27 = scalar_select %p676_p11, 1, 0 }
  0x14   : > { %s687_s6 = scalar_lea.hbm %s804_s0, %s408_s30  ;;  %s157_s7 = scalar_lea.vmem [#allocation2], %s397_s29 }
  0x15   : > { %s167_s8 = sshll.u32 %s157_s7, 4  ;;  %p693_p0 = pnand %p422_p13, %p659_p4  ;;  %s689_s8 = int_to_ptr.vmem [resolvable:$true] %s167_s8 }
  0x16   : > { %s154_s10 = scalar_lea.sflag [#allocation3], %s153_s28  ;;  %s480_s11 = scalar_lea.hbm %s687_s6, 128 }
  0x17   : > { %p481_p3 = scmp.ne.s32.totalorder %s687_s6, %s480_s11  ;;  %p482_p5 = pneg %p693_p0 }
  0x18   : > { %s485_s21 = scalar_lea.hbm %s804_s0, 256  ;;  %p486_p4 = scmp.lt.u32.totalorder %s687_s6, %s804_s0 }
  0x19   : > { %p483_p6 = pnand %p482_p5, %p481_p3  ;;  %p487_p10 = scmp.lt.u32.totalorder %s485_s21, %s480_s11 }
  0x1a   : > { %p489_p12 = scmp.lt.u32.totalorder %s480_s11, %s687_s6 }
  0x1b   : > { %p484_p7 = pneg %p483_p6  ;;  %p488_p13 = por %p487_p10, %p486_p4 }
  0x1d   : > { %p490_p1 = por %p489_p12, %p488_p13 }
  0x1f   : > { %p491_p2 = pnand %p490_p1, %p484_p7 }
  0x21   : > { %494 = shalt.err (!%p491_p2)
}
  0x22   : > { %s495_s28 = scalar_lea.vmem %s689_s8, 128  ;;  %s594_s29 = smov [#allocation2]  }
  0x23   : > { %p496_p3 = scmp.ne.s32.totalorder %s689_s8, %s495_s28  ;;  %s500_s30 = sshll.u32 %s594_s29, 4  ;;  %s501_s30 = int_to_ptr.vmem [resolvable:$false] %s500_s30 }
  0x24   : > { %s502_s4 = scalar_lea.vmem %s501_s30, 256  ;;  %p503_p9 = scmp.lt.s32.totalorder %s689_s8, %s501_s30 }
  0x25   : > { %p498_p6 = pnand %p496_p3, %p482_p5  ;;  %p504_p4 = scmp.lt.s32.totalorder %s502_s4, %s495_s28 }
  0x27   : > { %p499_p11 = pneg %p498_p6  ;;  %p505_p10 = por %p504_p4, %p503_p9 }
  0x29   : > { %p506_p12 = pnand %p505_p10, %p499_p11 }
  0x2b   : > { %509 = shalt.err (!%p506_p12)
}
  0x2c   : > { %417 = dma.hbm_to_vmem [thread:$0]  (!%p693_p0), %s687_s6, 128, %s689_s8, %s154_s10  }
  0x2d   : > { %p814_p1 = scmp.lt.s32.totalorder %s592_s17, 3  ;;  %p815_p2 = scmp.ge.s32.totalorder %s592_s17, 1 }
  0x2f   : > { %p173_p5 = pnand %p815_p2, %p814_p1 }
  0x30   : > { %s729_s5 = sand.u32 (!%p173_p5), 1, %s576_s13  }
  0x31   : > { %176 = sbr.rel (%p173_p5) target bundleno = 209 (0xd1), region = 32  ;;  %s401_s7 = sshll.u32 (!%p173_p5), %s729_s5, 3 }
  0x32   : > { %s179_s11 = scalar_lea.sflag (!%p173_p5), [#allocation3], %s729_s5  ;;  %s182_s9 = scalar_lea.vmem (!%p173_p5), [#allocation2], %s401_s7 }
  0x38   : > { %563 = dma.done.wait (%p665_p8), %s179_s11, 128  }
  0x39   : > { %565 = vsyncadd (%p665_p8), %s179_s11, 4294967168  ;;  %v595_v0 = vmov 0   ;;  %v263_v1 = vld [vmem:[%s805_s1] sm:$0xf]  ;;  %vm211_vm0 = vcmask 1043456   ;;  %v271_v45 = vlaneseq  ;;  %s409_s24 = sshll.u32 %s584_s15, 7 }
  0x3a   : > { %474 = vset.pattern.permute.xlu0 %v595_v0  ;;  %v277_v2 = vld [vmem:[%s806_s2] sm:$0xf]  ;;  %v596_v43 = vmov 839922192   ;;  %s204_s19 = scalar_lea.vmem [#allocation5], %s401_s7  ;;  %s755_s28 = scalar_lea.hbm %s807_s3, %s409_s24 }
  0x3b   : > { %266 = vperm.xlu0 %474, %v263_v1   ;;  %v207_v3 = vld [vmem:[%s182_s9] sm:$0xff]  ;;  %v269_v44 = vunpack.c.l.s4 %v596_v43  ;;  %v272_v48 = vshrl.u32 %v271_v45, 7  ;;  %s309_s21 = sshll.u32 %s204_s19, 4  ;;  %s293_s29 = scalar_lea.sflag [#allocation4], %s729_s5  ;;  %s757_s21 = int_to_ptr.vmem [resolvable:$true] %s309_s21 }
  0x3c   : > { %v209_v4 = vcombine.high %v207_v3, %v207_v3  ;;  %v212_v5 = vsel %vm211_vm0, %v207_v3, 0.0  ;;  %s510_s30 = scalar_lea.vmem %s757_s21, 128  ;;  %p816_p9 = scmp.ne.s32.totalorder %s811_s25, 0 }
  0x3d   : > { %v213_v7 = vrot.slane %v212_v5, 4  ;;  %v270_v47 = vunpack.c.0.s8 %v269_v44  ;;  %p511_p8 = scmp.ne.s32.totalorder %s757_s21, %s510_s30  ;;  %s597_s15 = smov [#allocation5]  }
  0x3e   : > { %v219_v6 = vsel %vm211_vm0, %v209_v4, 0.0  ;;  %s514_s4 = sshll.u32 %s597_s15, 4  ;;  %s515_s4 = int_to_ptr.vmem [resolvable:$false] %s514_s4 }
  0x3f   : > { %280 = vperm.xlu0 %474, %v277_v2   ;;  %v220_v8 = vrot.slane %v219_v6, 4  ;;  %v214_v9 = vadd.f32 %v213_v7, %v212_v5  ;;  %v273_v50 = vsub.s32 %v270_v47, %v272_v48  ;;  %p512_p11 = pnand %p511_p8, %p816_p9  ;;  %s516_s7 = scalar_lea.vmem %s515_s4, 256 }
  0x40   : > { %p517_p7 = scmp.lt.s32.totalorder %s757_s21, %s515_s4  ;;  %p518_p13 = scmp.lt.s32.totalorder %s516_s7, %s510_s30 }
  0x41   : > { %v221_v10 = vadd.f32 %v220_v8, %v219_v6  ;;  %v215_v11 = vrot.slane %v214_v9, 2  ;;  %p513_p0 = pneg %p512_p11 }
  0x42   : > { %p519_p3 = por %p518_p13, %p517_p7 }
  0x43   : > { %v222_v12 = vrot.slane %v221_v10, 2  ;;  %v216_v13 = vadd.f32 %v215_v11, %v214_v9 }
  0x44   : > { %p520_p6 = pnand %p519_p3, %p513_p0 }
  0x45   : > { %v223_v14 = vadd.f32 %v222_v12, %v221_v10  ;;  %v217_v15 = vrot.slane %v216_v13, 1 }
  0x47   : > { %v224_v16 = vrot.slane %v223_v14, 1  ;;  %v218_v17 = vadd.f32 %v217_v15, %v216_v13 }
  0x49   : > { %v225_v18 = vadd.f32 %v224_v16, %v223_v14  ;;  %v227_v19 = vmul.f32 0.25, %v218_v17 }
  0x4b   : > { %v228_v20 = vmul.f32 0.25, %v225_v18 }
  0x4d   : > { %v231_v21 = vcombine.low %v227_v19, %v228_v20 }
  0x4f   : > { %v233_v22 = vsub.f32 %v207_v3, %v231_v21 }
  0x51   : > { %v234_v23 = vmul.f32 %v233_v22, %v233_v22 }
  0x53   : > { %v236_v24 = vcombine.high %v234_v23, %v234_v23  ;;  %v238_v25 = vsel %vm211_vm0, %v234_v23, 0.0 }
  0x54   : > { %v239_v27 = vrot.slane %v238_v25, 4 }
  0x55   : > { %v245_v26 = vsel %vm211_vm0, %v236_v24, 0.0 }
  0x56   : > { %v246_v28 = vrot.slane %v245_v26, 4  ;;  %v240_v29 = vadd.f32 %v239_v27, %v238_v25 }
  0x58   : > { %v247_v30 = vadd.f32 %v246_v28, %v245_v26  ;;  %v241_v31 = vrot.slane %v240_v29, 2 }
  0x5a   : > { %v248_v32 = vrot.slane %v247_v30, 2  ;;  %v242_v33 = vadd.f32 %v241_v31, %v240_v29 }
  0x5c   : > { %v249_v34 = vadd.f32 %v248_v32, %v247_v30  ;;  %v243_v35 = vrot.slane %v242_v33, 1 }
  0x5e   : > { %v250_v36 = vrot.slane %v249_v34, 1  ;;  %v244_v37 = vadd.f32 %v243_v35, %v242_v33 }
  0x60   : > { %v251_v38 = vadd.f32 %v250_v36, %v249_v34  ;;  %v252_v39 = vmul.f32 0.25, %v244_v37 }
  0x62   : > { %v253_v40 = vmul.f32 0.25, %v251_v38  ;;  %v254_v41 = vadd.f32 1e-06, %v252_v39 }
  0x64   : > { %v255_v42 = vadd.f32 1e-06, %v253_v40  ;;  %476 = vrsqrt.f32 %v254_v41 }
  0x66   : > { %478 = vrsqrt.f32 %v255_v42 }
  0x6e   : > { %v477_v46 = vpop.eup %476 }
  0x70   : > { %v479_v49 = vpop.eup %478 }
  0x71   : > { %v260_v51 = vcombine.low %v477_v46, %v479_v49 }
  0x73   : > { %v262_v53 = vmul.f32 %v260_v51, %v233_v22 }
  0xba   : > { %v267_v52 = vpop.permute.xlu0 %266 }
  0xbb   : > { %v274_v54 = vrot.slane %v267_v52, %v273_v50 }
  0xbd   : > { %v276_v56 = vmul.f32 %v274_v54, %v262_v53 }
  0xbe   : > { %v281_v55 = vpop.permute.xlu0 %280 }
  0xbf   : > { %v288_v57 = vrot.slane %v281_v55, %v273_v50 }
  0xc1   : > { %v290_v58 = vadd.f32 %v288_v57, %v276_v56 }
  0xc3   : > { %291 = vst [vmem:[%s204_s19] sm:$0xff] %v290_v58 }
  0xc4   : > { %523 = shalt.err (!%p520_p6)
}
  0xc5   : > { %s524_s5 = scalar_lea.hbm %s755_s28, 128  ;;  %s528_s6 = scalar_lea.hbm %s807_s3, 256 }
  0xc6   : > { %p525_p4 = scmp.ne.s32.totalorder %s755_s28, %s524_s5  ;;  %p529_p1 = scmp.lt.u32.totalorder %s755_s28, %s807_s3 }
  0xc7   : > { %p530_p2 = scmp.lt.u32.totalorder %s528_s6, %s524_s5  ;;  %p532_p8 = scmp.lt.u32.totalorder %s524_s5, %s755_s28 }
  0xc8   : > { %p526_p10 = pnand %p525_p4, %p816_p9 }
  0xc9   : > { %p531_p5 = por %p530_p2, %p529_p1 }
  0xca   : > { %p527_p12 = pneg %p526_p10 }
  0xcb   : > { %p533_p11 = por %p532_p8, %p531_p5 }
  0xcd   : > { %p534_p0 = pnand %p533_p11, %p527_p12 }
  0xcf   : > { %537 = shalt.err (!%p534_p0)
}
  0xd0   : > { %412 = dma.vmem_to_hbm [thread:$0]  (%p816_p9), %s757_s21, 128, %s755_s28, %s293_s29  }
  0xd1 PF: > { %s321_s18 = sand.u32 1, %s572_s12   ;;  %p817_p7 = scmp.ne.s32.totalorder %s812_s27, 0 }
  0xd2   : > { %p818_p13 = scmp.ge.s32.totalorder %s592_s17, 2  ;;  %s322_s24 = scalar_lea.sflag [#allocation4], %s321_s18 }
  0xd4   : > { %p419_p3 = pnand %p818_p13, %p817_p7 }
  0xd6   : > { %567 = dma.done.wait (!%p419_p3), %s322_s24, 128  }
  0xd7   : > { %569 = vsyncadd (!%p419_p3), %s322_s24, 4294967168  ;;  %s19_s17 = sadd.s32 1, %s592_s17   ;;  %s819_s12 = smov %s576_s13 }
  0xd8   : > { %p16_p6 = scmp.ge.s32.totalorder %s19_s17, 4   ;;  %s820_s13 = smov %s580_s14 }
  0xd9   : > { %s821_s14 = smov %s674_s26  ;;  %s822_s15 = smov %s588_s16 }
  0xda   : > { %s823_s16 = smov %s825_s20  ;;  %18 = sbr.rel (!%p16_p6) target bundleno = 6 (0x6), region = 77 }
  0xe1   :  { %327 = vsyncpa [#allocation3], 1 }
  0xe2   :  { %329 = vsyncpa [#allocation3 + $0x1], 1 }
  0xe3   :  { %330 = vsyncpa [#allocation4], 1 }
  0xe4   :  { %332 = vsyncpa [#allocation4 + $0x1], 1 }

</bundles_post_ra>
